<compile_context>
chip_gen: v7x
topology: tpu7x:2x2x1
jax: 0.10.0
libtpu: 0.0.40
codegen_flags: <defaults>
</compile_context>

<pallas_src>
import jax
import jax.numpy as jnp
from jax.experimental import pallas as pl
from jax.experimental.pallas import tpu as pltpu


def _round_up(x, m):
    return ((x + m - 1) // m) * m


_HAS_BUFFERED = hasattr(pl, "Buffered")


def _const_block_spec(shape):
    """BlockSpec with a constant index_map (block is resident across the grid).

    Requests a single VMEM buffer when the installed Pallas supports
    `pipeline_mode=pl.Buffered(1)`; otherwise falls back to the plain spec
    (still correct, just double-buffered).  Returns (spec, is_single_buffered).
    """
    idx = lambda i: (0, 0)
    if _HAS_BUFFERED:
        try:
            return pl.BlockSpec(shape, idx, pipeline_mode=pl.Buffered(1)), True
        except TypeError:  # older BlockSpec without pipeline_mode kwarg
            pass
    return pl.BlockSpec(shape, idx), False


def _vmem_capacity_bytes():
    """Physical per-core VMEM; conservative 64 MiB (v7x) if the query fails."""
    try:
        info = pltpu.get_tpu_info()
        cap = getattr(info, "vmem_capacity_bytes", None)
        if cap:
            return int(cap)
    except Exception:
        pass
    return 64 << 20


def _pick_bm(batch, in_size, h1, h2, latent, x_bytes, out_bytes, vmem_cap):
    """Pick the batch tile: big enough to amortize grid-step overhead, small
    enough to leave VMEM headroom, balanced across v7x's two TensorCores."""
    if batch <= 16:
        return max(1, batch)
    # Target an x tile of ~4 MiB (grid-step overhead ~0.35us dominates tiny tiles).
    target_rows = max(16, (4 << 20) // max(1, in_size * x_bytes))
    # Per-row VMEM: double-buffered x, f32 activations, double-buffered output.
    per_row = (2 * in_size * x_bytes
               + (h1 + h2 + latent) * 4
               + 2 * latent * out_bytes)
    rows_cap = max(16, ((vmem_cap * 3 // 8) // max(1, per_row)) // 16 * 16)
    bm = min(target_rows, rows_cap, _round_up(batch, 16))
    bm = max(16, _round_up(bm, 16))
    # v7x (64 MiB VMEM, 2 TensorCores): keep an even number of parallel steps so
    # neither core idles on a tail step.  No-op on single-TC v5e/v6e sizing.
    if vmem_cap <= (64 << 20) and batch > bm:
        steps = _round_up(pl.cdiv(batch, bm), 2)
        bm = max(16, _round_up(pl.cdiv(batch, steps), 16))
    return bm


def _encoder_kernel(x_ref, w1_ref, b1_ref, w2_ref, b2_ref, w3_ref, b3_ref, z_ref):
    cd = w1_ref.dtype
    # Cast x to the MXU compute dtype on the VPU (hides under DMA/MXU); the
    # HBM->VMEM DMA stays at the input's native dtype.
    x = x_ref[...].astype(cd)
    # Layer 1: MXU matmul, f32 accumulation; bias add + ReLU stay in f32 (VPU).
    h = jnp.dot(x, w1_ref[...], preferred_element_type=jnp.float32)
    h = jnp.maximum(h + b1_ref[...], 0.0)
    # Layer 2.
    h = jnp.dot(h.astype(cd), w2_ref[...], preferred_element_type=jnp.float32)
    h = jnp.maximum(h + b2_ref[...], 0.0)
    # Layer 3.
    z = jnp.dot(h.astype(cd), w3_ref[...], preferred_element_type=jnp.float32)
    z = jnp.maximum(z + b3_ref[...], 0.0)
    z_ref[...] = z.astype(z_ref.dtype)


def prepare_encoder_params(params, compute_dtype=jnp.bfloat16):
    """One-time prep (hoisted out of the hot path): weights -> compute dtype,
    biases -> f32, shaped (1, out) for a broadcastable in-kernel add."""
    w1, b1, w2, b2, w3, b3 = params
    cd = compute_dtype
    return (w1.astype(cd), b1.astype(jnp.float32).reshape(1, -1),
            w2.astype(cd), b2.astype(jnp.float32).reshape(1, -1),
            w3.astype(cd), b3.astype(jnp.float32).reshape(1, -1))


def encoder_forward(x, prepared_params, *, bm=None, x_buffers=None):
    """Run the whole Encoder MLP inside one Pallas kernel, tiled over batch.

    `prepared_params` must come from `prepare_encoder_params` (weights already in
    the MXU compute dtype, biases f32).  `x_buffers` optionally deepens the x/out
    pipeline (e.g. 3 on v7x if DMA is still exposed).
    """
    w1, b1, w2, b2, w3, b3 = prepared_params
    B, in_size = x.shape
    h1 = w1.shape[1]
    h2 = w2.shape[1]
    latent = w3.shape[1]
    out_dtype = x.dtype

    x_bytes = jnp.dtype(x.dtype).itemsize
    w_bytes = jnp.dtype(w1.dtype).itemsize
    o_bytes = jnp.dtype(out_dtype).itemsize

    vmem_cap = _vmem_capacity_bytes()

    # ---- batch tile / grid ---------------------------------------------------
    if bm is None:
        bm = _pick_bm(B, in_size, h1, h2, latent, x_bytes, o_bytes, vmem_cap)
    bm = max(1, min(bm, _round_up(B, 16)))
    grid = (pl.cdiv(B, bm),)

    # ---- block specs ----------------------------------------------------------
    w1_spec, single_buf = _const_block_spec((in_size, h1))
    b1_spec, _ = _const_block_spec((1, h1))
    w2_spec, _ = _const_block_spec((h1, h2))
    b2_spec, _ = _const_block_spec((1, h2))
    w3_spec, _ = _const_block_spec((h2, latent))
    b3_spec, _ = _const_block_spec((1, latent))

    x_map = lambda i: (i, 0)
    if x_buffers is not None and _HAS_BUFFERED:
        x_spec = pl.BlockSpec((bm, in_size), x_map, pipeline_mode=pl.Buffered(x_buffers))
        out_spec = pl.BlockSpec((bm, latent), x_map, pipeline_mode=pl.Buffered(x_buffers))
        x_nbuf = x_buffers
    else:
        x_spec = pl.BlockSpec((bm, in_size), x_map)
        out_spec = pl.BlockSpec((bm, latent), x_map)
        x_nbuf = 2

    in_specs = [x_spec, w1_spec, b1_spec, w2_spec, b2_spec, w3_spec, b3_spec]

    # ---- VMEM budget (weights counted once when single-buffered) --------------
    weight_elems = in_size * h1 + h1 * h2 + h2 * latent
    weight_bufs = 1 if single_buf else 2
    vmem_need = (
        x_nbuf * bm * in_size * x_bytes                      # x tiles
        + x_nbuf * bm * latent * o_bytes                     # out tiles
        + weight_bufs * weight_elems * w_bytes               # weights
        + weight_bufs * (h1 + h2 + latent) * 4               # biases (f32)
        + bm * (h1 + h2 + latent) * 4                        # f32 activations
    )
    # Generation-aware ceiling: leave headroom for Mosaic internal scratch.
    vmem_ceiling = (56 << 20) if vmem_cap <= (64 << 20) else (100 << 20)
    vmem_limit = int(min(max(int(vmem_need * 1.5) + (4 << 20), 32 << 20), vmem_ceiling))

    flops = 2 * B * (in_size * h1 + h1 * h2 + h2 * latent)
    bytes_accessed = (
        B * in_size * x_bytes
        + weight_elems * w_bytes
        + (h1 + h2 + latent) * 4
        + B * latent * o_bytes
    )
    cost = pl.CostEstimate(flops=flops, transcendentals=0,
                           bytes_accessed=bytes_accessed)

    return pl.pallas_call(
        _encoder_kernel,
        out_shape=jax.ShapeDtypeStruct((B, latent), out_dtype),
        grid_spec=pltpu.PrefetchScalarGridSpec(
            num_scalar_prefetch=0,
            grid=grid,
            in_specs=in_specs,
            out_specs=out_spec,
        ),
        compiler_params=pltpu.CompilerParams(
            dimension_semantics=("parallel",),
            vmem_limit_bytes=vmem_limit,
        ),
        cost_estimate=cost,
    )(x, w1, b1, w2, b2, w3, b3)


def init_encoder_params(key, in_size, latent_size, dtype=jnp.float32):
    """Deterministic init mimicking nn.Linear's U(-1/sqrt(fan_in), 1/sqrt(fan_in)).

    Weights are stored as (in, out) == transpose of PyTorch's (out, in).
    """
    h1 = in_size // 2
    h2 = in_size // 4
    dims = [(in_size, h1), (h1, h2), (h2, latent_size)]
    params = []
    for (fan_in, fan_out) in dims:
        key, kw, kb = jax.random.split(key, 3)
        bound = 1.0 / jnp.sqrt(float(fan_in))
        w = jax.random.uniform(kw, (fan_in, fan_out), dtype, -bound, bound)
        b = jax.random.uniform(kb, (1, fan_out), dtype, -bound, bound)
        params.extend([w, b])
    return tuple(params)


def encoder_reference(x, prepared_params):
    """Pure-JAX reference with the same operand dtypes as the kernel path."""
    w1, b1, w2, b2, w3, b3 = prepared_params
    cd = w1.dtype
    prec = jax.lax.Precision.HIGHEST
    h = jnp.dot(x.astype(cd), w1, preferred_element_type=jnp.float32, precision=prec)
    h = jnp.maximum(h + b1, 0.0)
    h = jnp.dot(h.astype(cd), w2, preferred_element_type=jnp.float32, precision=prec)
    h = jnp.maximum(h + b2, 0.0)
    z = jnp.dot(h.astype(cd), w3, preferred_element_type=jnp.float32, precision=prec)
    z = jnp.maximum(z + b3, 0.0)
    return z.astype(x.dtype)


if __name__ == "__main__":
    # Small shapes consistent with the module (in_size divisible by 4).
    B = 16
    IN_SIZE = 128
    LATENT = 32

    key = jax.random.PRNGKey(0)
    key, kx = jax.random.split(key)
    x = jax.random.normal(kx, (B, IN_SIZE), jnp.float32)
    raw_params = init_encoder_params(key, IN_SIZE, LATENT)

    # f32 operand path — tight tolerance vs a precision-pinned reference.
    p_f32 = prepare_encoder_params(raw_params, compute_dtype=jnp.float32)
    z_f32 = jax.block_until_ready(encoder_forward(x, p_f32))
    ref_f32 = encoder_reference(x, p_f32)
    assert z_f32.shape == (B, LATENT), z_f32.shape
    assert jnp.allclose(z_f32, ref_f32, atol=1e-4, rtol=1e-4), "f32 mismatch"

    # Production path: bf16 operands into the MXU, f32 accumulation / epilogue.
    p_bf16 = prepare_encoder_params(raw_params, compute_dtype=jnp.bfloat16)
    z_bf16 = jax.block_until_ready(encoder_forward(x, p_bf16))
    ref_bf16 = encoder_reference(x, p_bf16)
    assert z_bf16.shape == (B, LATENT), z_bf16.shape
    assert jnp.allclose(z_bf16, ref_bf16, atol=2e-2, rtol=2e-2), "bf16 mismatch"

    print("KERNEL_OK")
</pallas_src>

<mosaic_0001>
module attributes {stable_mosaic.version = 11 : i64} {
  func.func @_encoder_kernel(%arg0: i32, %arg1: memref<16x128xf32, #tpu.memory_space<vmem>>, %arg2: memref<128x64xf32, #tpu.memory_space<vmem>>, %arg3: memref<1x64xf32, #tpu.memory_space<vmem>>, %arg4: memref<64x32xf32, #tpu.memory_space<vmem>>, %arg5: memref<1x32xf32, #tpu.memory_space<vmem>>, %arg6: memref<32x32xf32, #tpu.memory_space<vmem>>, %arg7: memref<1x32xf32, #tpu.memory_space<vmem>>, %arg8: memref<16x32xf32, #tpu.memory_space<vmem>>) attributes {dimension_semantics = [#tpu.dimension_semantics<parallel>], iteration_bounds = array<i64: 1>, scalar_prefetch = 0 : i64, scratch_operands = 0 : i64, tpu.core_type = #tpu.core_type<tc>, window_params = [{transform_indices = @transform_0, window_bounds = array<i64: 16, 128>}, {pipeline_mode = #tpu.pipeline_mode<synchronous>, transform_indices = @transform_1, window_bounds = array<i64: 128, 64>}, {pipeline_mode = #tpu.pipeline_mode<synchronous>, transform_indices = @transform_2, window_bounds = array<i64: 1, 64>}, {pipeline_mode = #tpu.pipeline_mode<synchronous>, transform_indices = @transform_3, window_bounds = array<i64: 64, 32>}, {pipeline_mode = #tpu.pipeline_mode<synchronous>, transform_indices = @transform_4, window_bounds = array<i64: 1, 32>}, {pipeline_mode = #tpu.pipeline_mode<synchronous>, transform_indices = @transform_5, window_bounds = array<i64: 32, 32>}, {pipeline_mode = #tpu.pipeline_mode<synchronous>, transform_indices = @transform_6, window_bounds = array<i64: 1, 32>}, {transform_indices = @transform_7, window_bounds = array<i64: 16, 32>}]} {
    %c0 = arith.constant 0 : index
    %c0_0 = arith.constant 0 : index
    %0 = vector.load %arg1[%c0, %c0_0] : memref<16x128xf32, #tpu.memory_space<vmem>>, vector<16x128xf32>
    %c0_1 = arith.constant 0 : index
    %c0_2 = arith.constant 0 : index
    %1 = vector.load %arg2[%c0_1, %c0_2] : memref<128x64xf32, #tpu.memory_space<vmem>>, vector<128x64xf32>
    %cst = arith.constant dense<0.000000e+00> : vector<16x64xf32>
    %2 = tpu.matmul %0, %1, %cst {dimension_numbers = #tpu.dot_dimension_numbers<[1], [0], [0], [1], [0, 0, 1, 1], [], []>} : vector<16x128xf32>, vector<128x64xf32>, vector<16x64xf32> -> vector<16x64xf32>
    %c0_3 = arith.constant 0 : index
    %c0_4 = arith.constant 0 : index
    %3 = vector.load %arg3[%c0_3, %c0_4] : memref<1x64xf32, #tpu.memory_space<vmem>>, vector<1x64xf32>
    %4 = vector.broadcast %3 : vector<1x64xf32> to vector<16x64xf32>
    %5 = arith.addf %2, %4 : vector<16x64xf32>
    %cst_5 = arith.constant 0.000000e+00 : f32
    %6 = vector.broadcast %cst_5 : f32 to vector<16x64xf32>
    %7 = arith.maximumf %5, %6 : vector<16x64xf32>
    %c0_6 = arith.constant 0 : index
    %c0_7 = arith.constant 0 : index
    %8 = vector.load %arg4[%c0_6, %c0_7] : memref<64x32xf32, #tpu.memory_space<vmem>>, vector<64x32xf32>
    %cst_8 = arith.constant dense<0.000000e+00> : vector<16x32xf32>
    %9 = tpu.matmul %7, %8, %cst_8 {dimension_numbers = #tpu.dot_dimension_numbers<[1], [0], [0], [1], [0, 0, 1, 1], [], []>} : vector<16x64xf32>, vector<64x32xf32>, vector<16x32xf32> -> vector<16x32xf32>
    %c0_9 = arith.constant 0 : index
    %c0_10 = arith.constant 0 : index
    %10 = vector.load %arg5[%c0_9, %c0_10] : memref<1x32xf32, #tpu.memory_space<vmem>>, vector<1x32xf32>
    %11 = vector.broadcast %10 : vector<1x32xf32> to vector<16x32xf32>
    %12 = arith.addf %9, %11 : vector<16x32xf32>
    %cst_11 = arith.constant 0.000000e+00 : f32
    %13 = vector.broadcast %cst_11 : f32 to vector<16x32xf32>
    %14 = arith.maximumf %12, %13 : vector<16x32xf32>
    %c0_12 = arith.constant 0 : index
    %c0_13 = arith.constant 0 : index
    %15 = vector.load %arg6[%c0_12, %c0_13] : memref<32x32xf32, #tpu.memory_space<vmem>>, vector<32x32xf32>
    %cst_14 = arith.constant dense<0.000000e+00> : vector<16x32xf32>
    %16 = tpu.matmul %14, %15, %cst_14 {dimension_numbers = #tpu.dot_dimension_numbers<[1], [0], [0], [1], [0, 0, 1, 1], [], []>} : vector<16x32xf32>, vector<32x32xf32>, vector<16x32xf32> -> vector<16x32xf32>
    %c0_15 = arith.constant 0 : index
    %c0_16 = arith.constant 0 : index
    %17 = vector.load %arg7[%c0_15, %c0_16] : memref<1x32xf32, #tpu.memory_space<vmem>>, vector<1x32xf32>
    %18 = vector.broadcast %17 : vector<1x32xf32> to vector<16x32xf32>
    %19 = arith.addf %16, %18 : vector<16x32xf32>
    %cst_17 = arith.constant 0.000000e+00 : f32
    %20 = vector.broadcast %cst_17 : f32 to vector<16x32xf32>
    %21 = arith.maximumf %19, %20 : vector<16x32xf32>
    %c0_18 = arith.constant 0 : index
    %c0_19 = arith.constant 0 : index
    %22 = vector.load %arg8[%c0_18, %c0_19] : memref<16x32xf32, #tpu.memory_space<vmem>>, vector<16x32xf32>
    tpu.vector_store %arg8[%c0_18, %c0_19], %21 {strides = array<i32>} : memref<16x32xf32, #tpu.memory_space<vmem>>, vector<16x32xf32>,
    return
  }
  func.func @transform_0(%arg0: i32) -> (i32, i32) {
    %c0_i32 = arith.constant 0 : i32
    %c0_i32_0 = arith.constant 0 : i32
    return %arg0, %c0_i32 : i32, i32
  }
  func.func @transform_1(%arg0: i32) -> (i32, i32) {
    %c0_i32 = arith.constant 0 : i32
    %c0_i32_0 = arith.constant 0 : i32
    %c0_i32_1 = arith.constant 0 : i32
    return %c0_i32, %c0_i32_0 : i32, i32
  }
  func.func @transform_2(%arg0: i32) -> (i32, i32) {
    %c0_i32 = arith.constant 0 : i32
    %c0_i32_0 = arith.constant 0 : i32
    %c0_i32_1 = arith.constant 0 : i32
    return %c0_i32, %c0_i32_0 : i32, i32
  }
  func.func @transform_3(%arg0: i32) -> (i32, i32) {
    %c0_i32 = arith.constant 0 : i32
    %c0_i32_0 = arith.constant 0 : i32
    %c0_i32_1 = arith.constant 0 : i32
    return %c0_i32, %c0_i32_0 : i32, i32
  }
  func.func @transform_4(%arg0: i32) -> (i32, i32) {
    %c0_i32 = arith.constant 0 : i32
    %c0_i32_0 = arith.constant 0 : i32
    %c0_i32_1 = arith.constant 0 : i32
    return %c0_i32, %c0_i32_0 : i32, i32
  }
  func.func @transform_5(%arg0: i32) -> (i32, i32) {
    %c0_i32 = arith.constant 0 : i32
    %c0_i32_0 = arith.constant 0 : i32
    %c0_i32_1 = arith.constant 0 : i32
    return %c0_i32, %c0_i32_0 : i32, i32
  }
  func.func @transform_6(%arg0: i32) -> (i32, i32) {
    %c0_i32 = arith.constant 0 : i32
    %c0_i32_0 = arith.constant 0 : i32
    %c0_i32_1 = arith.constant 0 : i32
    return %c0_i32, %c0_i32_0 : i32, i32
  }
  func.func @transform_7(%arg0: i32) -> (i32, i32) {
    %c0_i32 = arith.constant 0 : i32
    %c0_i32_0 = arith.constant 0 : i32
    return %arg0, %c0_i32 : i32, i32
  }
}

</mosaic_0001>

<bundles_post_ra>
// kernel: tpu_custom_call.1
= control target key start
LH: loop header
LB: loop body
LE: loop exit
PB: predicated region body
PF: predicated region fallthrough
CT: control target
= control target key end

     0   :  { %s688_s0 = inlined_call_operand.vmem [shape: f32[16,128], index: 0, kind: input, shape index: {}]   ;;  %s689_s1 = inlined_call_operand.vmem [shape: f32[128,64], index: 1, kind: input, shape index: {}]   ;;  %s690_s2 = inlined_call_operand.vmem [shape: f32[1,64], index: 2, kind: input, shape index: {}]   ;;  %s691_s3 = inlined_call_operand.vmem [shape: f32[64,32], index: 3, kind: input, shape index: {}]   ;;  %s692_s4 = inlined_call_operand.vmem [shape: f32[1,32], index: 4, kind: input, shape index: {}]   ;;  %s693_s5 = inlined_call_operand.vmem [shape: f32[32,32], index: 5, kind: input, shape index: {}]   ;;  %s694_s6 = inlined_call_operand.vmem [shape: f32[1,32], index: 6, kind: input, shape index: {}]   ;;  %s695_s7 = inlined_call_operand.hbm [shape: f32[16,32], index: 7, kind: output, shape index: {}]  }
   0x1   :  { %v29_v0 = vld [vmem:[%s689_s1] sm:$0xff]  ;;  %v30_v1 = vld [vmem:[%s689_s1 + $0x8] sm:$0xff]  ;;  %v31_v2 = vld [vmem:[%s689_s1 + $0x10] sm:$0xff] }
   0x2   :  { %v447_v3 = vpack.c.bf16 %v30_v1, %v29_v0  ;;  %v32_v4 = vld [vmem:[%s689_s1 + $0x18] sm:$0xff]  ;;  %v33_v6 = vld [vmem:[%s689_s1 + $0x20] sm:$0xff]  ;;  %v34_v7 = vld [vmem:[%s689_s1 + $0x28] sm:$0xff] }
   0x3   :  { %v451_v5 = vpack.c.bf16 %v32_v4, %v31_v2  ;;  %v455_v8 = vpack.c.bf16 %v34_v7, %v33_v6  ;;  %v35_v9 = vld [vmem:[%s689_s1 + $0x30] sm:$0xff]  ;;  %v36_v10 = vld [vmem:[%s689_s1 + $0x38] sm:$0xff]  ;;  %v27_v11 = vld [vmem:[%s688_s0] sm:$0xff] }
   0x4   :  { %448 = vmatprep.subr.bf16.mxu0 %v447_v3  ;;  %414 = vmatprep.mubr.f32.mxu0 %v27_v11  ;;  %v129_v12 = vld [vmem:[%s691_s3] sm:$0xff]  ;;  %v130_v13 = vld [vmem:[%s691_s3 + $0x8] sm:$0xff]  ;;  %v131_v14 = vld [vmem:[%s691_s3 + $0x10] sm:$0xff] }
   0x5   :  { %450 = vmatpush3.bf16.msra.mxu0 %v447_v3  ;;  %v479_v15 = vpack.c.bf16 %v130_v13, %v129_v12  ;;  %v132_v16 = vld [vmem:[%s691_s3 + $0x18] sm:$0xff]  ;;  %v133_v18 = vld [vmem:[%s691_s3 + $0x20] sm:$0xff]  ;;  %v134_v19 = vld [vmem:[%s691_s3 + $0x28] sm:$0xff] }
   0x6   :  { %452 = vmatprep.subr.bf16.mxu0 %v451_v5  ;;  %v483_v17 = vpack.c.bf16 %v132_v16, %v131_v14 }
   0x9   :  { %454 = vmatpush3.bf16.msra.mxu0 %v451_v5 }
   0xa   :  { %12 = vsyncpa [#allocation3], 0  ;;  %456 = vmatprep.subr.bf16.mxu0 %v455_v8  ;;  %v459_v20 = vpack.c.bf16 %v36_v10, %v35_v9  ;;  %480 = vmatprep.subr.bf16.mxu1 %v479_v15  ;;  %v37_v21 = vld [vmem:[%s689_s1 + $0x40] sm:$0xff]  ;;  %v38_v22 = vld [vmem:[%s689_s1 + $0x48] sm:$0xff]  ;;  %v487_v23 = vpack.c.bf16 %v134_v19, %v133_v18  ;;  %vm144_vm0 = vcmask 523264   ;;  %vm239_vm1 = vcmask 261120  }
   0xb   :  { %482 = vmatpush3.bf16.msra.mxu1 %v479_v15  ;;  %v463_v24 = vpack.c.bf16 %v38_v22, %v37_v21  ;;  %v39_v25 = vld [vmem:[%s689_s1 + $0x50] sm:$0xff]  ;;  %v40_v26 = vld [vmem:[%s689_s1 + $0x58] sm:$0xff]  ;;  %v41_v28 = vld [vmem:[%s689_s1 + $0x60] sm:$0xff]  ;;  %s530_s16 = smov [#allocation2]  }
   0xc   :  { %484 = vmatprep.subr.bf16.mxu1 %v483_v17  ;;  %v467_v27 = vpack.c.bf16 %v40_v26, %v39_v25  ;;  %v42_v29 = vld [vmem:[%s689_s1 + $0x68] sm:$0xff]  ;;  %v43_v31 = vld [vmem:[%s689_s1 + $0x70] sm:$0xff]  ;;  %v44_v32 = vld [vmem:[%s689_s1 + $0x78] sm:$0xff]  ;;  %s330_s17 = sshll.u32 %s530_s16, 4  ;;  %s331_s17 = int_to_ptr.vmem [resolvable:$true] %s330_s17 }
   0xd   :  { %458 = vmatpush3.bf16.msra.mxu0 %v455_v8  ;;  %v471_v30 = vpack.c.bf16 %v42_v29, %v41_v28  ;;  %v475_v33 = vpack.c.bf16 %v44_v32, %v43_v31  ;;  %v28_v34 = vld [vmem:[%s688_s0 + $0x8] sm:$0xff]  ;;  %v135_v35 = vld [vmem:[%s691_s3 + $0x30] sm:$0xff]  ;;  %v136_v36 = vld [vmem:[%s691_s3 + $0x38] sm:$0xff]  ;;  %p511_p1 = scmp.lt.s32.totalorder %s331_s17, %s331_s17 }
   0xe   :  { %460 = vmatprep.subr.bf16.mxu0 %v459_v20  ;;  %v491_v37 = vpack.c.bf16 %v136_v36, %v135_v35  ;;  %v228_v38 = vld [vmem:[%s693_s5] sm:$0xff]  ;;  %v229_v39 = vld [vmem:[%s693_s5 + $0x8] sm:$0xff]  ;;  %v230_v48 = vld [vmem:[%s693_s5 + $0x10] sm:$0xff] }
   0xf   :  { %486 = vmatpush3.bf16.msra.mxu1 %v483_v17  ;;  %v495_v40 = vpack.c.bf16 %v229_v39, %v228_v38  ;;  %v341_v41 = vld [vmem:[%s690_s2] ss:$0 sm:$0xff]  ;;  %v231_v49 = vld [vmem:[%s693_s5 + $0x18] sm:$0xff] }
  0x10   :  { %488 = vmatprep.subr.bf16.mxu1 %v487_v23  ;;  %v499_v50 = vpack.c.bf16 %v231_v49, %v230_v48  ;;  %v342_v51 = vld [vmem:[%s692_s4] ss:$0 sm:$0xff]  ;;  %s506_s4 = scalar_lea.vmem %s331_s17, 256 }
  0x11   :  { %462 = vmatpush3.bf16.msra.mxu0 %v459_v20  ;;  %v345_v58 = vld [vmem:[%s694_s6] ss:$0 sm:$0xff]  ;;  %p507_p0 = scmp.ne.s32.totalorder %s331_s17, %s506_s4  ;;  %p512_p2 = scmp.lt.s32.totalorder %s506_s4, %s506_s4 }
  0x12   :  { %464 = vmatprep.subr.bf16.mxu0 %v463_v24 }
  0x13   :  { %490 = vmatpush3.bf16.msra.mxu1 %v487_v23  ;;  %p513_p3 = por %p512_p2, %p511_p1 }
  0x14   :  { %492 = vmatprep.subr.bf16.mxu1 %v491_v37 }
  0x15   :  { %466 = vmatpush3.bf16.msra.mxu0 %v463_v24  ;;  %p514_p4 = pnand %p513_p3, %p507_p0 }
  0x16   :  { %468 = vmatprep.subr.bf16.mxu0 %v467_v27 }
  0x17   :  { %494 = vmatpush3.bf16.msra.mxu1 %v491_v37 }
  0x18   :  { %496 = vmatprep.subr.bf16.mxu1 %v495_v40 }
  0x19   :  { %470 = vmatpush3.bf16.msra.mxu0 %v467_v27 }
  0x1a   :  { %472 = vmatprep.subr.bf16.mxu0 %v471_v30 }
  0x1d   :  { %474 = vmatpush3.bf16.msra.mxu0 %v471_v30 }
  0x1e   :  { %476 = vmatprep.subr.bf16.mxu0 %v475_v33 }
  0x21   :  { %478 = vmatpush3.bf16.msra.mxu0 %v475_v33 }
  0x24   :  { %415 = vmatmul.mubr.f32.vlgmr.msra.gmra.mrb[0].mxu0 %v28_v34 }
  0xf7   :  { %v416_v42 = vpop.f32.mrb[0].mxu0 }
  0xf8   :  { %v124_v43 = vadd.f32 %v416_v42, %v341_v41  ;;  %v118_v44 = vpop.f32.mrb[1].mxu0 }
  0xf9   :  { %v119_v45 = vadd.f32 %v341_v41, %v118_v44 }
  0xfa   :  { %v128_v47 = vmax.f32 %v124_v43, 0.0 }
  0xfb   :  { %v127_v46 = vmax.f32 %v119_v45, 0.0 }
  0xfd   :  { %433 = vmatprep.mubr.msk.f32.mxu1 %vm144_vm0, %v127_v46 }
  0xfe   :  { %434 = vmatmul.mubr.msk.f32.vlgmr.msra.gmra.mrb[0].mxu1 %vm144_vm0, %v128_v47 }
  0xff   :  { %498 = vmatpush3.bf16.msra.mxu1 %v495_v40 }
 0x100   :  { %500 = vmatprep.subr.bf16.mxu1 %v499_v50 }
 0x103   :  { %502 = vmatpush3.bf16.msra.mxu1 %v499_v50 }
 0x1d1   :  { %v435_v52 = vpop.f32.mrb[0].mxu1 }
 0x1d2   :  { %v223_v53 = vadd.f32 %v435_v52, %v342_v51  ;;  %v217_v54 = vpop.f32.mrb[1].mxu1 }
 0x1d3   :  { %v218_v55 = vadd.f32 %v342_v51, %v217_v54 }
 0x1d4   :  { %v227_v57 = vmax.f32 %v223_v53, 0.0 }
 0x1d5   :  { %v226_v56 = vmax.f32 %v218_v55, 0.0 }
 0x1d7   :  { %444 = vmatprep.mubr.msk.f32.mxu1 %vm239_vm1, %v226_v56 }
 0x1d8   :  { %445 = vmatmul.mubr.msk.f32.vlgmr.msra.gmra.mrb[2].mxu1 %vm239_vm1, %v227_v57 }
 0x2ab   :  { %v446_v59 = vpop.f32.mrb[2].mxu1 }
 0x2ac   :  { %v318_v60 = vadd.f32 %v446_v59, %v345_v58  ;;  %v312_v61 = vpop.f32.mrb[3].mxu1 }
 0x2ad   :  { %v313_v62 = vadd.f32 %v345_v58, %v312_v61 }
 0x2ae   :  { %v322_v63 = vmax.f32 %v318_v60, 0.0 }
 0x2af   :  { %v321_v0 = vmax.f32 %v313_v62, 0.0 }
 0x2b0   :  { %324 = vst.msk [vmem:[#allocation2 + $0x8] sm:$0xff] %vm239_vm1, %v322_v63 }
 0x2b1   :  { %323 = vst.msk [vmem:[#allocation2] sm:$0xff] %vm239_vm1, %v321_v0 }
 0x2b2   :  { %517 = shalt.err (!%p514_p4)
}
 0x2b3   :  { %s518_s19 = scalar_lea.hbm %s695_s7, 256 }
 0x2b4   :  { %p519_p5 = scmp.ne.s32.totalorder %s695_s7, %s518_s19  ;;  %p522_p6 = scmp.lt.u32.totalorder %s518_s19, %s695_s7 }
 0x2b6   :  { %p524_p7 = pnand %p522_p6, %p519_p5 }
 0x2b8   :  { %527 = shalt.err (!%p524_p7)
}
 0x2b9   :  { %s531_s24 = smov 128   ;;  %s532_s25 = smov 8  }
 0x2ba   :  { %336 = dma.vmem_to_hbm [thread:$0]  %s331_s17, 256, %s695_s7, [#allocation3], %s531_s24, %s531_s24, %s532_s25  }
 0x2bb   :  { %528 = dma.done.wait [#allocation3], 256  }
 0x2bc   :  { %529 = vsyncadd [#allocation3], 4294967040 }
 0x2bd   :  { %340 = vsyncpa [#allocation3], 1 }

</bundles_post_ra>
